<compile_context>
chip_gen: v6e
topology: v6e:2x2x1
jax: 0.10.0
libtpu: 0.0.40
codegen_flags: <defaults>
</compile_context>

<pallas_src>
import jax
import jax.numpy as jnp
from jax.experimental import pallas as pl
from jax.experimental.pallas import tpu as pltpu

_VMEM_LIMIT = 48 * 1024 * 1024  # safe on v7x (64 MiB physical) and v5e/v6e
_LOSS_LANES = 128               # lane-dense per-row loss output


# ---------------------------------------------------------------------------
# Kernel 1: encoder  (pool folded into fc -> L2 normalize), tiled over batch.
# ---------------------------------------------------------------------------
def encoder_kernel(x_ref, w_ref, b_ref, out_ref):
    # (TN, C*HW) bf16 @ (C*HW, D) bf16 -> (TN, D) f32 on the MXU.
    emb = jnp.dot(x_ref[...], w_ref[...], preferred_element_type=jnp.float32)
    emb = emb + b_ref[...]                                   # (1, D) f32 bias
    # F.normalize(dim=1): rsqrt (EUP) + multiply instead of sqrt + divide.
    inv_norm = jax.lax.rsqrt(
        jnp.sum(emb * emb, axis=-1, keepdims=True) + 1e-24)  # eps ~ (1e-12)^2
    out_ref[...] = (emb * inv_norm).astype(out_ref.dtype)


def _pick_row_tile(m, target=256):
    """Largest divisor of m that is a multiple of 16 (then 8) and <= target."""
    for step in (16, 8):
        best = 0
        t = step
        while t <= min(m, target):
            if m % t == 0:
                best = t
            t += step
        if best:
            return best
    return m


def encode_both(q_imgs, k_imgs, w, b, row_tile=None):
    """Encode query and key images in one pallas_call (shared encoder)."""
    N, C, H, W = q_imgs.shape
    HW = H * W
    D = w.shape[1]
    M = 2 * N

    # Layout plumbing in the wrapper: stack, flatten spatial, cast to bf16
    # (halves HBM traffic for the dominant image tensor).
    x = jnp.concatenate([q_imgs, k_imgs], axis=0).reshape(M, C * HW)
    x = x.astype(jnp.bfloat16)
    # Fold the 1x1 adaptive-avg-pool into the fc weight:
    #   emb[n,d] = sum_{c,h} x[n,c,h] * w[c,d] / HW
    w_pool = jnp.repeat(w.astype(jnp.float32) / HW, HW, axis=0).astype(jnp.bfloat16)
    b2 = b.reshape(1, D).astype(jnp.float32)

    if row_tile is None:
        row_tile = _pick_row_tile(M)
    assert M % row_tile == 0, "row_tile must divide 2*N"

    return pl.pallas_call(
        encoder_kernel,
        out_shape=jax.ShapeDtypeStruct((M, D), jnp.float32),
        grid=(M // row_tile,),
        in_specs=[
            pl.BlockSpec((row_tile, C * HW), lambda i: (i, 0)),  # image tile
            pl.BlockSpec((C * HW, D), lambda i: (0, 0)),         # pooled fc weight
            pl.BlockSpec((1, D), lambda i: (0, 0)),              # bias
        ],
        out_specs=pl.BlockSpec((row_tile, D), lambda i: (i, 0)),
        compiler_params=pltpu.CompilerParams(
            dimension_semantics=("parallel",),
            vmem_limit_bytes=_VMEM_LIMIT),
    )(x, w_pool, b2)


# ---------------------------------------------------------------------------
# Kernel 2: per-sub-batch similarity logits + per-row cross-entropy loss.
# Grid iterates over sub-batches (mirrors the torch.split loop), "parallel".
# ---------------------------------------------------------------------------
def moco_sim_loss_kernel(invt_ref, q_ref, k_ref, logits_ref, loss_ref):
    s = pl.program_id(0)
    inv_t = invt_ref[0]                               # precomputed 1/T (scalar, SMEM)

    # Cast to bf16 for MXU throughput; contract last dims (no .T / XLU transpose).
    q = q_ref[...].astype(jnp.bfloat16)               # (SB, D)
    k = k_ref[...].astype(jnp.bfloat16)               # (N, D)
    sim = jax.lax.dot_general(
        q, k, dimension_numbers=(((1,), (1,)), ((), ())),
        preferred_element_type=jnp.float32) * inv_t   # (SB, N) f32
    logits_ref[...] = sim

    SB, N = sim.shape
    row = jax.lax.broadcasted_iota(jnp.int32, (SB, N), 0)
    col = jax.lax.broadcasted_iota(jnp.int32, (SB, N), 1)
    labels = s * SB + row                             # all_labels[start_id:end_id]

    m = jnp.max(sim, axis=-1, keepdims=True)
    lse = jnp.log(jnp.sum(jnp.exp(sim - m), axis=-1, keepdims=True)) + m      # (SB,1)
    tgt = jnp.sum(jnp.where(col == labels, sim, 0.0), axis=-1, keepdims=True)  # (SB,1)
    # Per-row CE replicated across 128 lanes -> full-vreg (lane-dense) store
    # instead of a masked last-dim-1 store.
    loss_ref[...] = jnp.broadcast_to(lse - tgt, loss_ref.shape)


def sim_and_rowloss(q_norm, k_norm, inv_temp, sub_batch_size):
    N, D = q_norm.shape
    SB = sub_batch_size
    assert N % SB == 0, "sub_batch_size must divide N"
    n_sub = N // SB
    logits, rowloss = pl.pallas_call(
        moco_sim_loss_kernel,
        out_shape=(
            jax.ShapeDtypeStruct((N, N), jnp.float32),            # all_sims
            jax.ShapeDtypeStruct((N, _LOSS_LANES), jnp.float32),  # per-row CE (lane-rep)
        ),
        grid=(n_sub,),
        in_specs=[
            pl.BlockSpec(memory_space=pltpu.MemorySpace.SMEM),    # 1/T scalar
            pl.BlockSpec((SB, D), lambda s: (s, 0)),              # query sub-batch
            pl.BlockSpec((N, D), lambda s: (0, 0)),               # all keys (resident)
        ],
        out_specs=(
            pl.BlockSpec((SB, N), lambda s: (s, 0)),
            pl.BlockSpec((SB, _LOSS_LANES), lambda s: (s, 0)),
        ),
        compiler_params=pltpu.CompilerParams(
            dimension_semantics=("parallel",),                    # disjoint blocks -> v7x megacore
            vmem_limit_bytes=_VMEM_LIMIT),
    )(inv_temp, q_norm, k_norm)
    return logits, rowloss


# ---------------------------------------------------------------------------
# MoCo.forward
# ---------------------------------------------------------------------------
def moco_forward(all_query_imgs, all_key_imgs, params, sub_batch_size, row_tile=None):
    N = all_query_imgs.shape[0]
    w, b = params["fc_w"], params["fc_b"]
    T = jnp.clip(params["T"], 0.001, 1.0)             # self.T.clamp_(0.001, 1)
    inv_T = (1.0 / T).reshape(1).astype(jnp.float32)  # scalar reciprocal once

    # One encoder call over the stacked (query, key) batch; split afterwards.
    emb = encode_both(all_query_imgs, all_key_imgs, w, b, row_tile=row_tile)
    query_img_embeds = emb[:N]
    key_img_embeds = jax.lax.stop_gradient(emb[N:])   # key branch is torch.no_grad

    logits, rowloss = sim_and_rowloss(
        query_img_embeds, key_img_embeds, inv_T, sub_batch_size)

    # avg_loss = sum over sub-batches of (mean CE over sub) / n_sub
    #          = mean over all rows (equal-size sub-batches).
    avg_loss = rowloss[:, 0].mean()
    all_labels = jnp.arange(N, dtype=jnp.int32)
    return avg_loss, logits, all_labels


if __name__ == "__main__":
    key = jax.random.PRNGKey(0)
    N, C, H, W = 16, 4, 16, 16          # batch, channels, spatial
    D = 32                              # feature dim ("dim" in MoCo, small here)
    SUB = 8                             # sub_batch_size

    k1, k2, k3, k4 = jax.random.split(key, 4)
    query_imgs = jax.random.normal(k1, (N, C, H, W), jnp.float32)
    key_imgs = jax.random.normal(k2, (N, C, H, W), jnp.float32)

    params = {
        "fc_w": jax.random.normal(k3, (C, D), jnp.float32) * 0.1,   # encoder fc weight
        "fc_b": jax.random.normal(k4, (D,), jnp.float32) * 0.01,    # encoder fc bias
        "T": jnp.float32(0.07),                                     # nn.Parameter(T)
    }

    # row_tile=16 exercises the multi-step pipelined encoder grid at toy sizes.
    loss, all_sims, labels = moco_forward(query_imgs, key_imgs, params, SUB,
                                          row_tile=16)
    jax.block_until_ready((loss, all_sims, labels))
    assert all_sims.shape == (N, N) and labels.shape == (N,)
    assert bool(jnp.isfinite(loss))
    print("KERNEL_OK")
</pallas_src>

<mosaic_0001>
module attributes {stable_mosaic.version = 11 : i64} {
  func.func @encoder_kernel(%arg0: i32, %arg1: memref<16x1024xbf16, #tpu.memory_space<vmem>>, %arg2: memref<1024x32xbf16, #tpu.memory_space<vmem>>, %arg3: memref<1x32xf32, #tpu.memory_space<vmem>>, %arg4: memref<16x32xf32, #tpu.memory_space<vmem>>) attributes {dimension_semantics = [#tpu.dimension_semantics<parallel>], iteration_bounds = array<i64: 2>, scalar_prefetch = 0 : i64, scratch_operands = 0 : i64, tpu.core_type = #tpu.core_type<tc>, window_params = [{transform_indices = @transform_0, window_bounds = array<i64: 16, 1024>}, {pipeline_mode = #tpu.pipeline_mode<synchronous>, transform_indices = @transform_1, window_bounds = array<i64: 1024, 32>}, {pipeline_mode = #tpu.pipeline_mode<synchronous>, transform_indices = @transform_2, window_bounds = array<i64: 1, 32>}, {transform_indices = @transform_3, window_bounds = array<i64: 16, 32>}]} {
    %c0 = arith.constant 0 : index
    %c0_0 = arith.constant 0 : index
    %0 = vector.load %arg1[%c0, %c0_0] : memref<16x1024xbf16, #tpu.memory_space<vmem>>, vector<16x1024xbf16>
    %c0_1 = arith.constant 0 : index
    %c0_2 = arith.constant 0 : index
    %1 = vector.load %arg2[%c0_1, %c0_2] : memref<1024x32xbf16, #tpu.memory_space<vmem>>, vector<1024x32xbf16>
    %cst = arith.constant dense<0.000000e+00> : vector<16x32xf32>
    %2 = tpu.matmul %0, %1, %cst {dimension_numbers = #tpu.dot_dimension_numbers<[1], [0], [0], [1], [0, 0, 1, 1], [], []>} : vector<16x1024xbf16>, vector<1024x32xbf16>, vector<16x32xf32> -> vector<16x32xf32>
    %c0_3 = arith.constant 0 : index
    %c0_4 = arith.constant 0 : index
    %3 = vector.load %arg3[%c0_3, %c0_4] : memref<1x32xf32, #tpu.memory_space<vmem>>, vector<1x32xf32>
    %4 = vector.broadcast %3 : vector<1x32xf32> to vector<16x32xf32>
    %5 = arith.addf %2, %4 : vector<16x32xf32>
    %6 = arith.mulf %5, %5 : vector<16x32xf32>
    %cst_5 = arith.constant dense<0.000000e+00> : vector<16xf32>
    %7 = vector.multi_reduction <add>, %6, %cst_5 [1] : vector<16x32xf32> to vector<16xf32>
    %8 = vector.shape_cast %7 : vector<16xf32> to vector<16x1xf32>
    %cst_6 = arith.constant 1.000000e-24 : f32
    %9 = vector.broadcast %cst_6 : f32 to vector<16x1xf32>
    %10 = arith.addf %8, %9 : vector<16x1xf32>
    %11 = math.rsqrt %10 : vector<16x1xf32>
    %12 = vector.broadcast %11 : vector<16x1xf32> to vector<16x32xf32>
    %13 = arith.mulf %5, %12 : vector<16x32xf32>
    %c0_7 = arith.constant 0 : index
    %c0_8 = arith.constant 0 : index
    %14 = vector.load %arg4[%c0_7, %c0_8] : memref<16x32xf32, #tpu.memory_space<vmem>>, vector<16x32xf32>
    tpu.vector_store %arg4[%c0_7, %c0_8], %13 {strides = array<i32>} : memref<16x32xf32, #tpu.memory_space<vmem>>, vector<16x32xf32>,
    return
  }
  func.func @transform_0(%arg0: i32) -> (i32, i32) {
    %c0_i32 = arith.constant 0 : i32
    %c0_i32_0 = arith.constant 0 : i32
    return %arg0, %c0_i32 : i32, i32
  }
  func.func @transform_1(%arg0: i32) -> (i32, i32) {
    %c0_i32 = arith.constant 0 : i32
    %c0_i32_0 = arith.constant 0 : i32
    %c0_i32_1 = arith.constant 0 : i32
    return %c0_i32, %c0_i32_0 : i32, i32
  }
  func.func @transform_2(%arg0: i32) -> (i32, i32) {
    %c0_i32 = arith.constant 0 : i32
    %c0_i32_0 = arith.constant 0 : i32
    %c0_i32_1 = arith.constant 0 : i32
    return %c0_i32, %c0_i32_0 : i32, i32
  }
  func.func @transform_3(%arg0: i32) -> (i32, i32) {
    %c0_i32 = arith.constant 0 : i32
    %c0_i32_0 = arith.constant 0 : i32
    return %arg0, %c0_i32 : i32, i32
  }
}

</mosaic_0001>

<bundles_post_ra>
// kernel: tpu_custom_call.1
= control target key start
LH: loop header
LB: loop body
LE: loop exit
PB: predicated region body
PF: predicated region fallthrough
CT: control target
= control target key end

     0   :  { %8 = vsyncpa [#allocation3], 0  ;;  %s1680_s0 = inlined_call_operand.vmem [shape: bf16[32,1024], index: 0, kind: input, shape index: {}]   ;;  %s1681_s1 = inlined_call_operand.vmem [shape: bf16[1024,32], index: 1, kind: input, shape index: {}]   ;;  %s1682_s2 = inlined_call_operand.vmem [shape: f32[1,32], index: 2, kind: input, shape index: {}]   ;;  %s1683_s3 = inlined_call_operand.hbm [shape: f32[32,32], index: 3, kind: output, shape index: {}]  }
   0x1   :  { %10 = vsyncpa [#allocation3 + $0x1], 0  ;;  %s1370_s12 = smov 0   ;;  %s1372_s13 = smov 0  }
   0x2   :  { %s1374_s14 = smov 0   ;;  %s1376_s15 = smov 0  }
   0x3 LB: > { %s1391_s16 = sadd.s32 4294967295, %s1345_s15   ;;  %s1000_s17 = sadd.s32 4294967294, %s1345_s15   ;;  %s1345_s15 = sphi %s1376_s15, %s1689_s15   ;;  %s1341_s14 = sphi %s1374_s14, %s1688_s14   ;;  %s1337_s13 = sphi %s1372_s13, %s1687_s13   ;;  %s1333_s12 = sphi %s1370_s12, %s1686_s12  }
   0x4   : > { %s1395_s18 = sadd.s32 1, %s1345_s15   ;;  %s91_s19 = sadd.s32 1, %s1341_s14 }
   0x5   : > { %s88_s20 = ssub.s32 %s1345_s15, %s1395_s18  ;;  %p101_p0 = scmp.ne.s32.totalorder %s1341_s14, %s1337_s13 }
   0x6   : > { %p89_p1 = scmp.eq.s32.totalorder %s88_s20, 0  ;;  %p102_p2 = scmp.eq.s32.totalorder %s1391_s16, 1 }
   0x7   : > { %p107_p3 = scmp.ne.s32.totalorder %s1337_s13, %s1333_s12  ;;  %p108_p4 = scmp.eq.s32.totalorder %s1000_s17, 1 }
   0x8   : > { %s1406_s21 = scalar_select %p89_p1, %s1341_s14, %s91_s19  }
   0x9   : > { %p1408_p5 = por %p102_p2, %p101_p0  ;;  %p1412_p6 = por %p108_p4, %p107_p3 }
   0xa   : > { %p1003_p7 = scmp.ge.s32.totalorder %s1345_s15, 1  ;;  %p142_p8 = scmp.lt.s32.totalorder %s1345_s15, 3 }
   0xc   : > { %p143_p9 = pnand %p1003_p7, %p142_p8 }
   0xd   : > { %s1005_s11 = sshll.u32 (!%p143_p9), %s1391_s16, 1  ;;  %s1087_s17 = sshll.u32 (!%p143_p9), %s1391_s16, 8 }
   0xe   : > { %146 = sbr.rel (%p143_p9) target bundleno = 463 (0x1cf), region = 32  ;;  %p168_p10 = scmp.lt.s32.totalorder (!%p143_p9), %s1005_s11, 3 }
   0xf   : > { %s1347_s28 = smov (!%p143_p9), [#allocation2]  }
  0x10   : > { %s1289_s29 = sshll.u32 (!%p143_p9), %s1347_s28, 4  ;;  %s1290_s29 = int_to_ptr.vmem [resolvable:$false] %s1289_s29 }
  0x11   : > { %s1291_s30 = scalar_lea.vmem (!%p143_p9), %s1290_s29, 512 }
  0x13   : > { %v1217_v0 = vld [vmem:[%s1681_s1 + $0x78] sm:$0xff]   ;;  %v1221_v4 = vld [vmem:[%s1681_s1 + $0x70] sm:$0xff]   ;;  %v1225_v8 = vld [vmem:[%s1681_s1 + $0x68] sm:$0xff]   ;;  %s1691_s11 = smov (!%p168_p10, %s1005_s11), 3  ;;  %vm909_vm0 = vcmask 261120  }
  0x14   : > { %v1218_v1 = vld [vmem:[%s1681_s1 + $0xf8] sm:$0xff]   ;;  %1088 = vmatprep.subr.bf16.mxu0 %v1217_v0  ;;  %v1222_v5 = vld [vmem:[%s1681_s1 + $0xf0] sm:$0xff]   ;;  %v1226_v9 = vld [vmem:[%s1681_s1 + $0xe8] sm:$0xff]   ;;  %s1086_s26 = sshll.u32 %s1691_s11, 5 }
  0x15   : > { %v1219_v2 = vld [vmem:[%s1681_s1 + $0x38] sm:$0xff]   ;;  %1110 = vmatprep.subr.bf16.mxu1 %v1218_v1  ;;  %v1223_v6 = vld [vmem:[%s1681_s1 + $0x30] sm:$0xff]   ;;  %v1227_v10 = vld [vmem:[%s1681_s1 + $0x28] sm:$0xff]   ;;  %s1512_s8 = scalar_lea.vmem %s1680_s0, %s1086_s26  ;;  %s1635_s26 = scalar_lea.hbm %s1683_s3, %s1087_s17 }
  0x16   : > { %v1220_v3 = vld [vmem:[%s1681_s1 + $0xb8] sm:$0xff]   ;;  %1089 = vmatpush3.bf16.msra.mxu0 %v1219_v2  ;;  %v1224_v7 = vld [vmem:[%s1681_s1 + $0xb0] sm:$0xff]   ;;  %v1228_v11 = vld [vmem:[%s1681_s1 + $0xa8] sm:$0xff]  }
  0x17   : > { %1111 = vmatpush3.bf16.msra.mxu1 %v1220_v3  ;;  %1090 = vmatprep.subr.bf16.mxu0 %v1221_v4  ;;  %v1229_v12 = vld [vmem:[%s1681_s1 + $0x60] sm:$0xff]   ;;  %v1233_v16 = vld [vmem:[%s1681_s1 + $0x58] sm:$0xff]   ;;  %v1237_v20 = vld [vmem:[%s1681_s1 + $0x50] sm:$0xff]  }
  0x18   : > { %1112 = vmatprep.subr.bf16.mxu1 %v1222_v5  ;;  %v1230_v13 = vld [vmem:[%s1681_s1 + $0xe0] sm:$0xff]   ;;  %v1234_v17 = vld [vmem:[%s1681_s1 + $0xd8] sm:$0xff]   ;;  %v1238_v21 = vld [vmem:[%s1681_s1 + $0xd0] sm:$0xff]  }
  0x19   : > { %v1231_v14 = vld [vmem:[%s1681_s1 + $0x20] sm:$0xff]   ;;  %v1235_v18 = vld [vmem:[%s1681_s1 + $0x18] sm:$0xff]   ;;  %v1239_v22 = vld [vmem:[%s1681_s1 + $0x10] sm:$0xff]  }
  0x1a   : > { %1091 = vmatpush3.bf16.msra.mxu0 %v1223_v6  ;;  %v1232_v15 = vld [vmem:[%s1681_s1 + $0xa0] sm:$0xff]   ;;  %v1236_v19 = vld [vmem:[%s1681_s1 + $0x98] sm:$0xff]   ;;  %v1240_v23 = vld [vmem:[%s1681_s1 + $0x90] sm:$0xff]  }
  0x1b   : > { %1113 = vmatpush3.bf16.msra.mxu1 %v1224_v7  ;;  %1092 = vmatprep.subr.bf16.mxu0 %v1225_v8  ;;  %v1241_v24 = vld [vmem:[%s1681_s1 + $0x48] sm:$0xff]   ;;  %v1245_v28 = vld [vmem:[%s1681_s1 + $0x40] sm:$0xff]   ;;  %v1249_v40 = vld [vmem:[%s1681_s1 + $0x178] sm:$0xff]  }
  0x1c   : > { %1114 = vmatprep.subr.bf16.mxu1 %v1226_v9  ;;  %v1242_v25 = vld [vmem:[%s1681_s1 + $0xc8] sm:$0xff]   ;;  %v1246_v29 = vld [vmem:[%s1681_s1 + $0xc0] sm:$0xff]   ;;  %v1250_v41 = vld [vmem:[%s1681_s1 + $0x1f8] sm:$0xff]  }
  0x1d   : > { %v1243_v26 = vld [vmem:[%s1681_s1 + $0x8] sm:$0xff]   ;;  %v1247_v30 = vld [vmem:[%s1681_s1] sm:$0xff]   ;;  %v1251_v42 = vld [vmem:[%s1681_s1 + $0x138] sm:$0xff]  }
  0x1e   : > { %1093 = vmatpush3.bf16.msra.mxu0 %v1227_v10  ;;  %v1244_v27 = vld [vmem:[%s1681_s1 + $0x88] sm:$0xff]   ;;  %v1248_v31 = vld [vmem:[%s1681_s1 + $0x80] sm:$0xff]   ;;  %v1252_v43 = vld [vmem:[%s1681_s1 + $0x1b8] sm:$0xff]  }
  0x1f   : > { %1115 = vmatpush3.bf16.msra.mxu1 %v1228_v11  ;;  %1094 = vmatprep.subr.bf16.mxu0 %v1229_v12  ;;  %v176_v32 = vld [vmem:[%s1512_s8] sm:$0xff]  ;;  %v177_v34 = vld [vmem:[%s1512_s8 + $0x8] sm:$0xff]  ;;  %v1253_v44 = vld [vmem:[%s1681_s1 + $0x170] sm:$0xff]  }
  0x20   : > { %1116 = vmatprep.subr.bf16.mxu1 %v1230_v13  ;;  %v180_v33 = vld [vmem:[%s1512_s8 + $0x20] sm:$0xff]  ;;  %v181_v37 = vld [vmem:[%s1512_s8 + $0x28] sm:$0xff]  ;;  %v1254_v45 = vld [vmem:[%s1681_s1 + $0x1f0] sm:$0xff]  }
  0x21   : > { %v1009_v35 = vcombine.low %v176_v32, %v180_v33  ;;  %v1010_v36 = vcombine.high %v176_v32, %v180_v33  ;;  %v1011_v38 = vcombine.low %v177_v34, %v181_v37  ;;  %v1012_v39 = vcombine.high %v177_v34, %v181_v37  ;;  %v1255_v46 = vld [vmem:[%s1681_s1 + $0x130] sm:$0xff]   ;;  %v1257_v48 = vld [vmem:[%s1681_s1 + $0x168] sm:$0xff]   ;;  %v1261_v52 = vld [vmem:[%s1681_s1 + $0x160] sm:$0xff]  }
  0x22   : > { %1095 = vmatpush3.bf16.msra.mxu0 %v1231_v14  ;;  %v1256_v47 = vld [vmem:[%s1681_s1 + $0x1b0] sm:$0xff]   ;;  %v1258_v49 = vld [vmem:[%s1681_s1 + $0x1e8] sm:$0xff]   ;;  %v1262_v53 = vld [vmem:[%s1681_s1 + $0x1e0] sm:$0xff]  }
  0x23   : > { %1117 = vmatpush3.bf16.msra.mxu1 %v1232_v15  ;;  %1096 = vmatprep.subr.bf16.mxu0 %v1233_v16  ;;  %v1259_v50 = vld [vmem:[%s1681_s1 + $0x128] sm:$0xff]   ;;  %v1263_v54 = vld [vmem:[%s1681_s1 + $0x120] sm:$0xff]   ;;  %v1265_v56 = vld [vmem:[%s1681_s1 + $0x158] sm:$0xff]  }
  0x24   : > { %1118 = vmatprep.subr.bf16.mxu1 %v1234_v17  ;;  %775 = vmatprep.mubr.bf16.mxu0 %v1010_v36  ;;  %v1260_v51 = vld [vmem:[%s1681_s1 + $0x1a8] sm:$0xff]   ;;  %v1264_v55 = vld [vmem:[%s1681_s1 + $0x1a0] sm:$0xff]   ;;  %v1266_v57 = vld [vmem:[%s1681_s1 + $0x1d8] sm:$0xff]  }
  0x25   : > { %816 = vmatprep.mubr.bf16.mxu1 %v1012_v39  ;;  %v1267_v58 = vld [vmem:[%s1681_s1 + $0x118] sm:$0xff]   ;;  %v1269_v60 = vld [vmem:[%s1681_s1 + $0x150] sm:$0xff]   ;;  %v1273_v0 = vld [vmem:[%s1681_s1 + $0x148] sm:$0xff]  }
  0x26   : > { %1097 = vmatpush3.bf16.msra.mxu0 %v1235_v18  ;;  %v1268_v59 = vld [vmem:[%s1681_s1 + $0x198] sm:$0xff]   ;;  %v1270_v61 = vld [vmem:[%s1681_s1 + $0x1d0] sm:$0xff]   ;;  %v1274_v1 = vld [vmem:[%s1681_s1 + $0x1c8] sm:$0xff]  }
  0x27   : > { %1119 = vmatpush3.bf16.msra.mxu1 %v1236_v19  ;;  %1098 = vmatprep.subr.bf16.mxu0 %v1237_v20  ;;  %v1271_v62 = vld [vmem:[%s1681_s1 + $0x110] sm:$0xff]   ;;  %v1275_v2 = vld [vmem:[%s1681_s1 + $0x108] sm:$0xff]   ;;  %v1277_v4 = vld [vmem:[%s1681_s1 + $0x140] sm:$0xff]  }
  0x28   : > { %1120 = vmatprep.subr.bf16.mxu1 %v1238_v21  ;;  %v1272_v63 = vld [vmem:[%s1681_s1 + $0x190] sm:$0xff]   ;;  %v1276_v3 = vld [vmem:[%s1681_s1 + $0x188] sm:$0xff]   ;;  %v1278_v5 = vld [vmem:[%s1681_s1 + $0x1c0] sm:$0xff]  }
  0x29   : > { %v1279_v6 = vld [vmem:[%s1681_s1 + $0x100] sm:$0xff]   ;;  %v178_v8 = vld [vmem:[%s1512_s8 + $0x10] sm:$0xff]  ;;  %v179_v12 = vld [vmem:[%s1512_s8 + $0x18] sm:$0xff] }
  0x2a   : > { %1099 = vmatpush3.bf16.msra.mxu0 %v1239_v22  ;;  %v1280_v7 = vld [vmem:[%s1681_s1 + $0x180] sm:$0xff]   ;;  %v182_v9 = vld [vmem:[%s1512_s8 + $0x30] sm:$0xff]  ;;  %v183_v13 = vld [vmem:[%s1512_s8 + $0x38] sm:$0xff]  ;;  %s164_s8 = sand.u32 1, %s1337_s13  }
  0x2b   : > { %1121 = vmatpush3.bf16.msra.mxu1 %v1240_v23  ;;  %1100 = vmatprep.subr.bf16.mxu0 %v1241_v24  ;;  %v1013_v10 = vcombine.low %v178_v8, %v182_v9  ;;  %v1014_v11 = vcombine.high %v178_v8, %v182_v9  ;;  %v1015_v14 = vcombine.low %v179_v12, %v183_v13  ;;  %v1008_v23 = vld [vmem:[%s1682_s2] ss:$0 sm:$0xff]  ;;  %s1004_s10 = sshll.u32 %s164_s8, 4  ;;  %s1640_s27 = scalar_lea.sflag [#allocation3], %s164_s8 }
  0x2c   : > { %1122 = vmatprep.subr.bf16.mxu1 %v1242_v25  ;;  %v1016_v15 = vcombine.high %v179_v12, %v183_v13  ;;  %s166_s19 = scalar_lea.vmem [#allocation2], %s1004_s10 }
  0x2d   : > { %s938_s20 = sshll.u32 %s166_s19, 4  ;;  %s1637_s20 = int_to_ptr.vmem [resolvable:$true] %s938_s20 }
  0x2e   : > { %1101 = vmatpush3.bf16.msra.mxu0 %v1243_v26  ;;  %s1285_s16 = scalar_lea.vmem %s1637_s20, 256  ;;  %p1292_p0 = scmp.lt.s32.totalorder %s1637_s20, %s1290_s29 }
  0x2f   : > { %1123 = vmatpush3.bf16.msra.mxu1 %v1244_v27  ;;  %1102 = vmatprep.subr.bf16.mxu0 %v1245_v28  ;;  %p1286_p11 = scmp.ne.s32.totalorder %s1637_s20, %s1285_s16  ;;  %p1293_p1 = scmp.lt.s32.totalorder %s1291_s30, %s1285_s16 }
  0x30   : > { %1124 = vmatprep.subr.bf16.mxu1 %v1246_v29 }
  0x31   : > { %p1287_p12 = pnand %p1286_p11, %p1408_p5  ;;  %p1294_p2 = por %p1293_p1, %p1292_p0 }
  0x32   : > { %1103 = vmatpush3.bf16.msra.mxu0 %v1247_v30 }
  0x33   : > { %1125 = vmatpush3.bf16.msra.mxu1 %v1248_v31  ;;  %1132 = vmatprep.subr.bf16.mxu0 %v1249_v40  ;;  %p1288_p13 = pneg %p1287_p12 }
  0x34   : > { %1154 = vmatprep.subr.bf16.mxu1 %v1250_v41 }
  0x35   : > { %776 = vmatmul.mubr.bf16.vlgmr.msra.gmra.mxu0 %v1009_v35  ;;  %p1295_p3 = pnand %p1294_p2, %p1288_p13 }
  0x36   : > { %817 = vmatmul.mubr.bf16.vlgmr.msra.gmra.mxu1 %v1011_v38  ;;  %1133 = vmatpush3.bf16.msra.mxu0 %v1251_v42 }
  0x37   : > { %1155 = vmatpush3.bf16.msra.mxu1 %v1252_v43  ;;  %1134 = vmatprep.subr.bf16.mxu0 %v1253_v44 }
  0x38   : > { %1156 = vmatprep.subr.bf16.mxu1 %v1254_v45  ;;  %857 = vmatprep.mubr.bf16.mxu0 %v1014_v11 }
  0x39   : > { %898 = vmatprep.mubr.bf16.mxu1 %v1016_v15 }
  0x3a   : > { %1135 = vmatpush3.bf16.msra.mxu0 %v1255_v46 }
  0x3b   : > { %1157 = vmatpush3.bf16.msra.mxu1 %v1256_v47  ;;  %1136 = vmatprep.subr.bf16.mxu0 %v1257_v48 }
  0x3c   : > { %1158 = vmatprep.subr.bf16.mxu1 %v1258_v49 }
  0x3e   : > { %1137 = vmatpush3.bf16.msra.mxu0 %v1259_v50 }
  0x3f   : > { %1159 = vmatpush3.bf16.msra.mxu1 %v1260_v51  ;;  %1138 = vmatprep.subr.bf16.mxu0 %v1261_v52 }
  0x40   : > { %1160 = vmatprep.subr.bf16.mxu1 %v1262_v53 }
  0x42   : > { %1139 = vmatpush3.bf16.msra.mxu0 %v1263_v54 }
  0x43   : > { %1161 = vmatpush3.bf16.msra.mxu1 %v1264_v55  ;;  %1140 = vmatprep.subr.bf16.mxu0 %v1265_v56 }
  0x44   : > { %1162 = vmatprep.subr.bf16.mxu1 %v1266_v57 }
  0x46   : > { %1141 = vmatpush3.bf16.msra.mxu0 %v1267_v58 }
  0x47   : > { %1163 = vmatpush3.bf16.msra.mxu1 %v1268_v59  ;;  %1142 = vmatprep.subr.bf16.mxu0 %v1269_v60 }
  0x48   : > { %1164 = vmatprep.subr.bf16.mxu1 %v1270_v61 }
  0x4a   : > { %1143 = vmatpush3.bf16.msra.mxu0 %v1271_v62 }
  0x4b   : > { %1165 = vmatpush3.bf16.msra.mxu1 %v1272_v63  ;;  %1144 = vmatprep.subr.bf16.mxu0 %v1273_v0 }
  0x4c   : > { %1166 = vmatprep.subr.bf16.mxu1 %v1274_v1 }
  0x4e   : > { %1145 = vmatpush3.bf16.msra.mxu0 %v1275_v2 }
  0x4f   : > { %1167 = vmatpush3.bf16.msra.mxu1 %v1276_v3  ;;  %1146 = vmatprep.subr.bf16.mxu0 %v1277_v4 }
  0x50   : > { %1168 = vmatprep.subr.bf16.mxu1 %v1278_v5 }
  0x52   : > { %1147 = vmatpush3.bf16.msra.mxu0 %v1279_v6 }
  0x53   : > { %1169 = vmatpush3.bf16.msra.mxu1 %v1280_v7 }
  0x55   : > { %858 = vmatmul.mubr.bf16.vlgmr.msra.gmra.mxu0 %v1013_v10 }
  0x56   : > { %899 = vmatmul.mubr.bf16.vlgmr.msra.gmra.mxu1 %v1015_v14 }
  0xf5   : > { %v1104_v16 = vpop.f32.mrf.mxu0 }
  0xf6   : > { %v1126_v17 = vpop.f32.mrf.mxu1 }
  0xf7   : > { %v1105_v18 = vpop.f32.mrf.mxu0 }
  0xf8   : > { %v1127_v19 = vpop.f32.mrf.mxu1  ;;  %v1106_v21 = vadd.f32 %v1105_v18, %v1104_v16 }
  0xf9   : > { %v1107_v20 = vpop.f32.mrf.mxu0  ;;  %v1128_v26 = vadd.f32 %v1127_v19, %v1126_v17 }
  0xfa   : > { %v1129_v22 = vpop.f32.mrf.mxu1  ;;  %v778_v25 = vadd.f32 %v1106_v21, %v1008_v23 }
  0xfb   : > { %v1108_v24 = vpop.f32.mrf.mxu0 }
  0xfc   : > { %v1109_v27 = vadd.f32 %v1108_v24, %v1107_v20  ;;  %v1130_v28 = vpop.f32.mrf.mxu1  ;;  %v819_v32 = vadd.f32 %v1128_v26, %v778_v25 }
  0xfd   : > { %v1131_v37 = vadd.f32 %v1130_v28, %v1129_v22 }
  0xfe   : > { %v781_v33 = vadd.f32 %v1109_v27, %v1008_v23 }
 0x100   : > { %v822_v42 = vadd.f32 %v1131_v37, %v781_v33 }
 0x115   : > { %v1148_v29 = vpop.f32.mrf.mxu0 }
 0x116   : > { %v1170_v30 = vpop.f32.mrf.mxu1 }
 0x117   : > { %v1149_v31 = vpop.f32.mrf.mxu0 }
 0x118   : > { %v1150_v34 = vadd.f32 %v1149_v31, %v1148_v29  ;;  %v1171_v35 = vpop.f32.mrf.mxu1 }
 0x119   : > { %v1151_v36 = vpop.f32.mrf.mxu0  ;;  %v1172_v39 = vadd.f32 %v1171_v35, %v1170_v30 }
 0x11a   : > { %v860_v38 = vadd.f32 %v1150_v34, %v819_v32  ;;  %v1173_v40 = vpop.f32.mrf.mxu1 }
 0x11b   : > { %v1152_v41 = vpop.f32.mrf.mxu0 }
 0x11c   : > { %v901_v43 = vadd.f32 %v1172_v39, %v860_v38  ;;  %v1153_v44 = vadd.f32 %v1152_v41, %v1151_v36  ;;  %v1174_v45 = vpop.f32.mrf.mxu1 }
 0x11d   : > { %v1175_v47 = vadd.f32 %v1174_v45, %v1173_v40 }
 0x11e   : > { %v863_v46 = vadd.f32 %v1153_v44, %v822_v42  ;;  %v907_v48 = vmul.f32 %v901_v43, %v901_v43 }
 0x120   : > { %v904_v49 = vadd.f32 %v1175_v47, %v863_v46  ;;  %v910_v50 = vsel %vm909_vm0, %v907_v48, 0.0 }
 0x121   : > { %911 = vadd.xlane.f32.xlu0 %v910_v50 }
 0x122   : > { %v908_v51 = vmul.f32 %v904_v49, %v904_v49 }
 0x124   : > { %v913_v52 = vsel %vm909_vm0, %v908_v51, 0.0 }
 0x125   : > { %914 = vadd.xlane.f32.xlu0 %v913_v52 }
 0x1aa   : > { %v912_v53 = vpop.xlane.xlu0 %911 }
 0x1ab   : > { %v916_v54 = vadd.f32 1e-24, %v912_v53 }
 0x1ad   : > { %1281 = vrsqrt.f32 %v916_v54 }
 0x1ae   : > { %v915_v55 = vpop.xlane.xlu0 %914 }
 0x1af   : > { %v917_v56 = vadd.f32 1e-24, %v915_v55 }
 0x1b1   : > { %1283 = vrsqrt.f32 %v917_v56 }
 0x1ba   : > { %v1282_v57 = vpop.eup %1281 }
 0x1bb   : > { %v920_v58 = vmul.f32 %v1282_v57, %v901_v43 }
 0x1bd   : > { %922 = vst.msk [vmem:[%s166_s19] sm:$0xff] %vm909_vm0, %v920_v58 }
 0x1be   : > { %v1284_v59 = vpop.eup %1283 }
 0x1bf   : > { %v921_v60 = vmul.f32 %v1284_v59, %v904_v49 }
 0x1c1   : > { %923 = vst.msk [vmem:[%s166_s19 + $0x8] sm:$0xff] %vm909_vm0, %v921_v60 }
 0x1c2   : > { %1298 = shalt.err (!%p1295_p3)
}
 0x1c3   : > { %s1299_s4 = scalar_lea.hbm %s1635_s26, 256  ;;  %s1303_s7 = scalar_lea.hbm %s1683_s3, 512 }
 0x1c4   : > { %p1300_p4 = scmp.ne.s32.totalorder %s1635_s26, %s1299_s4  ;;  %p1304_p9 = scmp.lt.s32.totalorder %s1635_s26, %s1683_s3 }
 0x1c5   : > { %p1305_p10 = scmp.lt.s32.totalorder %s1303_s7, %s1299_s4 }
 0x1c6   : > { %p1301_p7 = pnand %p1300_p4, %p1408_p5 }
 0x1c7   : > { %p1306_p11 = por %p1305_p10, %p1304_p9 }
 0x1c8   : > { %p1302_p8 = pneg %p1301_p7 }
 0x1ca   : > { %p1307_p12 = pnand %p1306_p11, %p1302_p8 }
 0x1cc   : > { %1310 = shalt.err (!%p1307_p12)
}
 0x1cd   : > { %s1348_s8 = smov 128   ;;  %s1349_s10 = smov 8  }
 0x1ce   : > { %1176 = dma.vmem_to_hbm [thread:$0]  (%p1408_p5), %s1637_s20, 256, %s1635_s26, %s1640_s27, %s1348_s8, %s1348_s8, %s1349_s10  }
 0x1cf PF: > { %p1182_p13 = scmp.ge.s32.totalorder %s1345_s15, 2  ;;  %s953_s17 = sand.u32 1, %s1333_s12  }
 0x1d0   : > { %s954_s19 = scalar_lea.sflag [#allocation3], %s953_s17 }
 0x1d1   : > { %p1179_p0 = pnand %p1182_p13, %p1412_p6 }
 0x1d3   : > { %p1180_p1 = pneg %p1179_p0 }
 0x1d5   : > { %1328 = dma.done.wait (%p1180_p1), %s954_s19, 256  }
 0x1d6   : > { %1330 = vsyncadd (%p1180_p1), %s954_s19, 4294967040  ;;  %p13_p2 = scmp.ge.s32.totalorder %s1395_s18, 4   ;;  %s1686_s12 = smov %s1337_s13 }
 0x1d7   : > { %s1687_s13 = smov %s1341_s14  ;;  %s1688_s14 = smov %s1406_s21 }
 0x1d8   : > { %s1689_s15 = smov %s1395_s18  ;;  %15 = sbr.rel (!%p13_p2) target bundleno = 3 (0x3), region = 67 }
 0x1dd   :  { %959 = vsyncpa [#allocation3], 1 }
 0x1de   :  { %961 = vsyncpa [#allocation3 + $0x1], 1 }

</bundles_post_ra>
